<compile_context>
chip_gen: v7x
topology: tpu7x:2x2x1
jax: 0.10.0
libtpu: 0.0.40
codegen_flags: <defaults>
</compile_context>

<pallas_src>
import jax
import jax.numpy as jnp
from jax.experimental import pallas as pl
from jax.experimental.pallas import tpu as pltpu

LOG_SIG_MAX = 2.0
LOG_SIG_MIN = -20.0
LOG_2PI = 1.8378770664093453

# Native MXU input dtype on v5e/v6e/v7x; accumulation stays f32.
MXU_DTYPE = jnp.bfloat16


# ---------------------------------------------------------------------------
# Fused per-task kernel: encoder MLP -> PoG posterior -> rsample z -> policy MLP
# ---------------------------------------------------------------------------
def _pearl_fused_kernel(
    ctx_ref, obs_ref, eps_z_ref, eps_a_ref,       # per-task blocks
    w_in_ref, w_hh_ref, w_head_ref, b_ref,        # resident weight/bias slabs
    action_ref, mean_ref, log_std_ref, log_prob_ref, pre_tanh_ref, task_z_ref,
):
    f32 = jnp.float32
    N, ctx_dim = ctx_ref.shape
    B, obs_dim = obs_ref.shape
    L = eps_z_ref.shape[-1]
    A = eps_a_ref.shape[-1]
    H = w_hh_ref.shape[-1]

    b_all = b_ref[...]                                   # (9, Pb) f32

    def dense(x, w, b):
        # Weights are pre-cast bf16 (no per-call cast); accumulate + bias in f32.
        return jnp.dot(x.astype(MXU_DTYPE), w, preferred_element_type=f32) + b

    # ---- context encoder: this task's N transitions --------------------------
    x = ctx_ref[...]                                     # (N, ctx_dim) f32
    h = jnp.maximum(dense(x, w_in_ref[0][:ctx_dim, :], b_all[0:1, :H]), 0.0)
    h = jnp.maximum(dense(h, w_hh_ref[0], b_all[1:2, :H]), 0.0)
    h = jnp.maximum(dense(h, w_hh_ref[1], b_all[2:3, :H]), 0.0)
    mu = dense(h, w_head_ref[0][:, :L], b_all[3:4, :L])      # == params[..., :L]
    sig_raw = dense(h, w_head_ref[1][:, :L], b_all[4:5, :L])  # == params[..., L:]

    # ---- product of Gaussians over the N transitions (sublane reduce) --------
    sig_sq = jnp.maximum(jax.nn.softplus(sig_raw), 1e-7)     # clamp(softplus, 1e-7)
    inv = 1.0 / sig_sq                                       # exact divide (f32)
    sum_inv = jnp.sum(inv, axis=0, keepdims=True)            # (1, L)
    sum_mu_inv = jnp.sum(mu * inv, axis=0, keepdims=True)    # (1, L)
    z_var = 1.0 / sum_inv
    z_mean = z_var * sum_mu_inv
    z = z_mean + jnp.sqrt(z_var) * eps_z_ref[...]            # Normal rsample, (1, L)

    # task_z = z repeated for each of this task's B observations (free broadcast).
    task_z_ref[...] = jnp.broadcast_to(z, (B, L))

    # ---- policy: first layer split as obs @ w1_obs + broadcast(z @ w1_z) -----
    obs = obs_ref[...]                                       # (B, obs_dim)
    zc = jnp.dot(z.astype(MXU_DTYPE), w_in_ref[2][:L, :],
                 preferred_element_type=f32)                 # (1, H)
    h1 = jnp.maximum(dense(obs, w_in_ref[1][:obs_dim, :], b_all[5:6, :H]) + zc, 0.0)
    h2 = jnp.maximum(dense(h1, w_hh_ref[2], b_all[6:7, :H]), 0.0)
    mean = dense(h2, w_head_ref[2][:, :A], b_all[7:8, :A])
    log_std = jnp.clip(dense(h2, w_head_ref[3][:, :A], b_all[8:9, :A]),
                       LOG_SIG_MIN, LOG_SIG_MAX)
    std = jnp.exp(log_std)
    eps = eps_a_ref[...]
    pre_tanh = mean + std * eps                              # Normal(mean, std).rsample()
    action = jnp.tanh(pre_tanh)
    # (pre_tanh - mean)/std == eps by construction -> simplified normal log-prob
    normal_lp = -0.5 * eps * eps - log_std - 0.5 * LOG_2PI
    lp = normal_lp - jnp.log(1.0 - action * action + 1e-6)   # rlkit tanh correction
    log_prob = jnp.sum(lp, axis=-1, keepdims=True)           # (B, 1)

    action_ref[...] = action
    mean_ref[...] = mean
    log_std_ref[...] = log_std
    log_prob_ref[...] = log_prob
    pre_tanh_ref[...] = pre_tanh


# ---------------------------------------------------------------------------
# One-time parameter packing: bf16 weight slabs + one f32 bias slab (8 inputs total).
# ---------------------------------------------------------------------------
def pack_params(enc_params, pol_params):
    e, p = enc_params, pol_params
    H = e["w2"].shape[0]
    L = e["bo_mu"].shape[-1]
    A = p["bm"].shape[-1]
    ctx_dim = e["w1"].shape[0]
    obs_dim = p["w1_obs"].shape[0]

    max_in = max(ctx_dim, obs_dim, L)
    ph = max(L, A)
    pb = max(H, L, A)

    def pad_rows(w, rows):
        return jnp.pad(w, ((0, rows - w.shape[0]), (0, 0)))

    def pad_cols(w, cols):
        return jnp.pad(w, ((0, 0), (0, cols - w.shape[1])))

    def pad_bias(b, width):
        b = b.reshape(-1)
        return jnp.pad(b, (0, width - b.shape[0]))

    w_in = jnp.stack([pad_rows(e["w1"], max_in),
                      pad_rows(p["w1_obs"], max_in),
                      pad_rows(p["w1_z"], max_in)]).astype(MXU_DTYPE)
    w_hh = jnp.stack([e["w2"], e["w3"], p["w2"]]).astype(MXU_DTYPE)
    w_head = jnp.stack([pad_cols(e["wo_mu"], ph),
                        pad_cols(e["wo_sig"], ph),
                        pad_cols(p["wm"], ph),
                        pad_cols(p["ws"], ph)]).astype(MXU_DTYPE)
    b_all = jnp.stack([pad_bias(e["b1"], pb), pad_bias(e["b2"], pb),
                       pad_bias(e["b3"], pb), pad_bias(e["bo_mu"], pb),
                       pad_bias(e["bo_sig"], pb), pad_bias(p["b1"], pb),
                       pad_bias(p["b2"], pb), pad_bias(p["bm"], pb),
                       pad_bias(p["bs"], pb)]).astype(jnp.float32)
    return dict(w_in=w_in, w_hh=w_hh, w_head=w_head, b_all=b_all)


# ---------------------------------------------------------------------------
# PEARLAgent.forward (use_ib=True, use_VQ=False, for_update=False)
# ---------------------------------------------------------------------------
def pearl_agent_forward(obs, context, packed, latent_dim, action_dim, key):
    T, B, obs_dim = obs.shape
    _, N, ctx_dim = context.shape
    L, A = latent_dim, action_dim

    k_z, k_a = jax.random.split(key)
    eps_z = jax.random.normal(k_z, (T, 1, L), jnp.float32)
    eps_a = jax.random.normal(k_a, (T, B, A), jnp.float32)

    w_in, w_hh, w_head, b_all = (packed["w_in"], packed["w_hh"],
                                 packed["w_head"], packed["b_all"])

    def const_spec(shape):
        nd = len(shape)
        return pl.BlockSpec(shape, lambda t, _nd=nd: (0,) * _nd)

    in_specs = [
        pl.BlockSpec((None, N, ctx_dim), lambda t: (t, 0, 0)),   # ctx (per task)
        pl.BlockSpec((None, B, obs_dim), lambda t: (t, 0, 0)),   # obs (per task)
        pl.BlockSpec((None, 1, L), lambda t: (t, 0, 0)),         # eps_z
        pl.BlockSpec((None, B, A), lambda t: (t, 0, 0)),         # eps_a
        const_spec(w_in.shape),                                  # resident weights
        const_spec(w_hh.shape),
        const_spec(w_head.shape),
        const_spec(b_all.shape),
    ]
    out_specs = (
        pl.BlockSpec((None, B, A), lambda t: (t, 0, 0)),   # action
        pl.BlockSpec((None, B, A), lambda t: (t, 0, 0)),   # mean
        pl.BlockSpec((None, B, A), lambda t: (t, 0, 0)),   # log_std
        pl.BlockSpec((None, B, 1), lambda t: (t, 0, 0)),   # log_prob
        pl.BlockSpec((None, B, A), lambda t: (t, 0, 0)),   # pre_tanh
        pl.BlockSpec((None, B, L), lambda t: (t, 0, 0)),   # task_z
    )
    out_shape = (
        jax.ShapeDtypeStruct((T, B, A), jnp.float32),
        jax.ShapeDtypeStruct((T, B, A), jnp.float32),
        jax.ShapeDtypeStruct((T, B, A), jnp.float32),
        jax.ShapeDtypeStruct((T, B, 1), jnp.float32),
        jax.ShapeDtypeStruct((T, B, A), jnp.float32),
        jax.ShapeDtypeStruct((T, B, L), jnp.float32),
    )

    # TODO(synk): for very large N or B, add a second grid axis over row-blocks
    # (>=512 rows) with pl.when-guarded PoG accumulation; size blocks against
    # v7x's 64 MiB physical VMEM and v5e's 16 MiB scoped default.
    outs = pl.pallas_call(
        _pearl_fused_kernel,
        grid=(T,),
        in_specs=in_specs,
        out_specs=out_specs,
        out_shape=out_shape,
        compiler_params=pltpu.CompilerParams(
            dimension_semantics=("parallel",),        # v7x megacore over tasks
            vmem_limit_bytes=32 * 1024 * 1024,        # safe on v5e/v6e/v7x
        ),
    )(context, obs, eps_z, eps_a, w_in, w_hh, w_head, b_all)

    action, mean, log_std, log_prob, pre_tanh, task_z = outs
    policy_outputs = (
        action.reshape(T * B, A),
        mean.reshape(T * B, A),
        log_std.reshape(T * B, A),
        log_prob.reshape(T * B, 1),
        pre_tanh.reshape(T * B, A),
    )
    # use_ib=True, for_update=False  ->  return (policy_outputs, task_z)
    return policy_outputs, task_z.reshape(T * B, L)


# ---------------------------------------------------------------------------
# Deterministic parameter init (FlattenMlp encoder: 3 hidden layers -> 2*latent
# outputs; TanhGaussianPolicy: 2 hidden layers -> mean / log_std heads).
# Encoder output head and policy first layer are split host-side so the kernel
# never slices along the lane axis at a non-zero offset and never concatenates.
# ---------------------------------------------------------------------------
def _init_linear(key, d_in, d_out):
    kw, kb = jax.random.split(key)
    scale = 1.0 / jnp.sqrt(jnp.float32(d_in))
    w = jax.random.uniform(kw, (d_in, d_out), jnp.float32, -scale, scale)
    b = jax.random.uniform(kb, (1, d_out), jnp.float32, -scale, scale)
    return w, b


def init_params(key, ctx_dim, obs_dim, action_dim, latent_dim, hidden):
    keys = jax.random.split(key, 10)
    ew1, eb1 = _init_linear(keys[0], ctx_dim, hidden)
    ew2, eb2 = _init_linear(keys[1], hidden, hidden)
    ew3, eb3 = _init_linear(keys[2], hidden, hidden)
    ewo, ebo = _init_linear(keys[3], hidden, 2 * latent_dim)
    enc = dict(
        w1=ew1, b1=eb1, w2=ew2, b2=eb2, w3=ew3, b3=eb3,
        wo_mu=ewo[:, :latent_dim], bo_mu=ebo[:, :latent_dim],
        wo_sig=ewo[:, latent_dim:], bo_sig=ebo[:, latent_dim:],
    )

    pin = obs_dim + latent_dim
    pw1, pb1 = _init_linear(keys[4], pin, hidden)
    pw2, pb2 = _init_linear(keys[5], hidden, hidden)
    pwm, pbm = _init_linear(keys[6], hidden, action_dim)
    pws, pbs = _init_linear(keys[7], hidden, action_dim)
    pol = dict(
        w1_obs=pw1[:obs_dim], w1_z=pw1[obs_dim:], b1=pb1,
        w2=pw2, b2=pb2, wm=pwm, bm=pbm, ws=pws, bs=pbs,
    )

    # self.W parameter (latent_dim, latent_dim): present in __init__, unused in
    # this forward path (use_ib=True, use_VQ=False); kept for fidelity.
    W = jax.random.uniform(keys[8], (latent_dim, latent_dim), jnp.float32)
    return enc, pol, W


if __name__ == "__main__":
    # Small shapes consistent with the module's forward:
    T = 2          # num tasks
    N = 8          # context transitions per task
    B = 4          # obs per task
    obs_dim = 11
    action_dim = 4
    reward_dim = 1
    ctx_dim = obs_dim + action_dim + reward_dim   # use_next_obs_in_context=False
    latent_dim = 8
    hidden = 32

    root = jax.random.PRNGKey(0)
    k_param, k_obs, k_ctx, k_noise = jax.random.split(root, 4)
    enc_params, pol_params, W = init_params(
        k_param, ctx_dim, obs_dim, action_dim, latent_dim, hidden)
    packed = pack_params(enc_params, pol_params)          # bf16 cast + slab packing, once

    obs = jax.random.normal(k_obs, (T, B, obs_dim), jnp.float32)
    context = jax.random.normal(k_ctx, (T, N, ctx_dim), jnp.float32)

    fwd = jax.jit(pearl_agent_forward, static_argnums=(3, 4))
    policy_outputs, task_z = fwd(obs, context, packed, latent_dim, action_dim, k_noise)

    jax.block_until_ready(policy_outputs)
    jax.block_until_ready(task_z)

    action, mean, log_std, log_prob, pre_tanh = policy_outputs
    assert action.shape == (T * B, action_dim)
    assert mean.shape == (T * B, action_dim)
    assert log_std.shape == (T * B, action_dim)
    assert log_prob.shape == (T * B, 1)
    assert pre_tanh.shape == (T * B, action_dim)
    assert task_z.shape == (T * B, latent_dim)
    assert bool(jnp.all(jnp.isfinite(action)))
    assert bool(jnp.all(jnp.isfinite(log_prob)))
    assert bool(jnp.all(jnp.isfinite(task_z)))
    # TODO(synk): VQ codebook / context-discriminator branches (use_VQ=True) are
    # data-structure-heavy (python dict matching) and not exercised in this path.
    print("KERNEL_OK")
</pallas_src>

<mosaic_0001>
module attributes {stable_mosaic.version = 11 : i64} {
  func.func @_pearl_fused_kernel(%arg0: i32, %arg1: memref<1x8x16xf32, #tpu.memory_space<vmem>>, %arg2: memref<1x4x11xf32, #tpu.memory_space<vmem>>, %arg3: memref<1x1x8xf32, #tpu.memory_space<vmem>>, %arg4: memref<1x4x4xf32, #tpu.memory_space<vmem>>, %arg5: memref<3x16x32xbf16, #tpu.memory_space<vmem>>, %arg6: memref<3x32x32xbf16, #tpu.memory_space<vmem>>, %arg7: memref<4x32x8xbf16, #tpu.memory_space<vmem>>, %arg8: memref<9x32xf32, #tpu.memory_space<vmem>>, %arg9: memref<1x4x4xf32, #tpu.memory_space<vmem>>, %arg10: memref<1x4x4xf32, #tpu.memory_space<vmem>>, %arg11: memref<1x4x4xf32, #tpu.memory_space<vmem>>, %arg12: memref<1x4x1xf32, #tpu.memory_space<vmem>>, %arg13: memref<1x4x4xf32, #tpu.memory_space<vmem>>, %arg14: memref<1x4x8xf32, #tpu.memory_space<vmem>>) attributes {dimension_semantics = [#tpu.dimension_semantics<parallel>], iteration_bounds = array<i64: 2>, scalar_prefetch = 0 : i64, scratch_operands = 0 : i64, tpu.core_type = #tpu.core_type<tc>, window_params = [{transform_indices = @transform_0, window_bounds = array<i64: 1, 8, 16>}, {transform_indices = @transform_1, window_bounds = array<i64: 1, 4, 11>}, {transform_indices = @transform_2, window_bounds = array<i64: 1, 1, 8>}, {transform_indices = @transform_3, window_bounds = array<i64: 1, 4, 4>}, {pipeline_mode = #tpu.pipeline_mode<synchronous>, transform_indices = @transform_4, window_bounds = array<i64: 3, 16, 32>}, {pipeline_mode = #tpu.pipeline_mode<synchronous>, transform_indices = @transform_5, window_bounds = array<i64: 3, 32, 32>}, {pipeline_mode = #tpu.pipeline_mode<synchronous>, transform_indices = @transform_6, window_bounds = array<i64: 4, 32, 8>}, {pipeline_mode = #tpu.pipeline_mode<synchronous>, transform_indices = @transform_7, window_bounds = array<i64: 9, 32>}, {transform_indices = @transform_8, window_bounds = array<i64: 1, 4, 4>}, {transform_indices = @transform_9, window_bounds = array<i64: 1, 4, 4>}, {transform_indices = @transform_10, window_bounds = array<i64: 1, 4, 4>}, {transform_indices = @transform_11, window_bounds = array<i64: 1, 4, 1>}, {transform_indices = @transform_12, window_bounds = array<i64: 1, 4, 4>}, {transform_indices = @transform_13, window_bounds = array<i64: 1, 4, 8>}]} {
    %c0 = arith.constant 0 : index
    %c0_0 = arith.constant 0 : index
    %0 = vector.load %arg8[%c0, %c0_0] : memref<9x32xf32, #tpu.memory_space<vmem>>, vector<9x32xf32>
    %c0_1 = arith.constant 0 : index
    %c0_2 = arith.constant 0 : index
    %c0_3 = arith.constant 0 : index
    %1 = vector.load %arg1[%c0_1, %c0_2, %c0_3] : memref<1x8x16xf32, #tpu.memory_space<vmem>>, vector<1x8x16xf32>
    %2 = vector.shape_cast %1 : vector<1x8x16xf32> to vector<8x16xf32>
    %c0_4 = arith.constant 0 : index
    %c0_5 = arith.constant 0 : index
    %c0_6 = arith.constant 0 : index
    %3 = vector.load %arg5[%c0_4, %c0_5, %c0_6] : memref<3x16x32xbf16, #tpu.memory_space<vmem>>, vector<1x16x32xbf16>
    %4 = vector.shape_cast %3 : vector<1x16x32xbf16> to vector<16x32xbf16>
    %5 = vector.extract_strided_slice %0 {offsets = [0, 0], sizes = [1, 32], strides = [1, 1]} : vector<9x32xf32> to vector<1x32xf32>
    %6 = arith.truncf %2 : vector<8x16xf32> to vector<8x16xbf16>
    %cst = arith.constant dense<0.000000e+00> : vector<8x32xf32>
    %7 = tpu.matmul %6, %4, %cst {dimension_numbers = #tpu.dot_dimension_numbers<[1], [0], [0], [1], [0, 0, 1, 1], [], []>} : vector<8x16xbf16>, vector<16x32xbf16>, vector<8x32xf32> -> vector<8x32xf32>
    %8 = vector.broadcast %5 : vector<1x32xf32> to vector<8x32xf32>
    %9 = arith.addf %7, %8 : vector<8x32xf32>
    %cst_7 = arith.constant 0.000000e+00 : f32
    %10 = vector.broadcast %cst_7 : f32 to vector<8x32xf32>
    %11 = arith.maximumf %9, %10 : vector<8x32xf32>
    %c0_8 = arith.constant 0 : index
    %c0_9 = arith.constant 0 : index
    %c0_10 = arith.constant 0 : index
    %12 = vector.load %arg6[%c0_8, %c0_9, %c0_10] : memref<3x32x32xbf16, #tpu.memory_space<vmem>>, vector<1x32x32xbf16>
    %13 = vector.shape_cast %12 : vector<1x32x32xbf16> to vector<32x32xbf16>
    %14 = vector.extract_strided_slice %0 {offsets = [1, 0], sizes = [1, 32], strides = [1, 1]} : vector<9x32xf32> to vector<1x32xf32>
    %15 = arith.truncf %11 : vector<8x32xf32> to vector<8x32xbf16>
    %cst_11 = arith.constant dense<0.000000e+00> : vector<8x32xf32>
    %16 = tpu.matmul %15, %13, %cst_11 {dimension_numbers = #tpu.dot_dimension_numbers<[1], [0], [0], [1], [0, 0, 1, 1], [], []>} : vector<8x32xbf16>, vector<32x32xbf16>, vector<8x32xf32> -> vector<8x32xf32>
    %17 = vector.broadcast %14 : vector<1x32xf32> to vector<8x32xf32>
    %18 = arith.addf %16, %17 : vector<8x32xf32>
    %cst_12 = arith.constant 0.000000e+00 : f32
    %19 = vector.broadcast %cst_12 : f32 to vector<8x32xf32>
    %20 = arith.maximumf %18, %19 : vector<8x32xf32>
    %c1 = arith.constant 1 : index
    %c0_13 = arith.constant 0 : index
    %c0_14 = arith.constant 0 : index
    %21 = vector.load %arg6[%c1, %c0_13, %c0_14] : memref<3x32x32xbf16, #tpu.memory_space<vmem>>, vector<1x32x32xbf16>
    %22 = vector.shape_cast %21 : vector<1x32x32xbf16> to vector<32x32xbf16>
    %23 = vector.extract_strided_slice %0 {offsets = [2, 0], sizes = [1, 32], strides = [1, 1]} : vector<9x32xf32> to vector<1x32xf32>
    %24 = arith.truncf %20 : vector<8x32xf32> to vector<8x32xbf16>
    %cst_15 = arith.constant dense<0.000000e+00> : vector<8x32xf32>
    %25 = tpu.matmul %24, %22, %cst_15 {dimension_numbers = #tpu.dot_dimension_numbers<[1], [0], [0], [1], [0, 0, 1, 1], [], []>} : vector<8x32xbf16>, vector<32x32xbf16>, vector<8x32xf32> -> vector<8x32xf32>
    %26 = vector.broadcast %23 : vector<1x32xf32> to vector<8x32xf32>
    %27 = arith.addf %25, %26 : vector<8x32xf32>
    %cst_16 = arith.constant 0.000000e+00 : f32
    %28 = vector.broadcast %cst_16 : f32 to vector<8x32xf32>
    %29 = arith.maximumf %27, %28 : vector<8x32xf32>
    %c0_17 = arith.constant 0 : index
    %c0_18 = arith.constant 0 : index
    %c0_19 = arith.constant 0 : index
    %30 = vector.load %arg7[%c0_17, %c0_18, %c0_19] : memref<4x32x8xbf16, #tpu.memory_space<vmem>>, vector<1x32x8xbf16>
    %31 = vector.shape_cast %30 : vector<1x32x8xbf16> to vector<32x8xbf16>
    %32 = vector.extract_strided_slice %0 {offsets = [3, 0], sizes = [1, 8], strides = [1, 1]} : vector<9x32xf32> to vector<1x8xf32>
    %33 = arith.truncf %29 : vector<8x32xf32> to vector<8x32xbf16>
    %cst_20 = arith.constant dense<0.000000e+00> : vector<8x8xf32>
    %34 = tpu.matmul %33, %31, %cst_20 {dimension_numbers = #tpu.dot_dimension_numbers<[1], [0], [0], [1], [0, 0, 1, 1], [], []>} : vector<8x32xbf16>, vector<32x8xbf16>, vector<8x8xf32> -> vector<8x8xf32>
    %35 = vector.broadcast %32 : vector<1x8xf32> to vector<8x8xf32>
    %36 = arith.addf %34, %35 : vector<8x8xf32>
    %c1_21 = arith.constant 1 : index
    %c0_22 = arith.constant 0 : index
    %c0_23 = arith.constant 0 : index
    %37 = vector.load %arg7[%c1_21, %c0_22, %c0_23] : memref<4x32x8xbf16, #tpu.memory_space<vmem>>, vector<1x32x8xbf16>
    %38 = vector.shape_cast %37 : vector<1x32x8xbf16> to vector<32x8xbf16>
    %39 = vector.extract_strided_slice %0 {offsets = [4, 0], sizes = [1, 8], strides = [1, 1]} : vector<9x32xf32> to vector<1x8xf32>
    %40 = arith.truncf %29 : vector<8x32xf32> to vector<8x32xbf16>
    %cst_24 = arith.constant dense<0.000000e+00> : vector<8x8xf32>
    %41 = tpu.matmul %40, %38, %cst_24 {dimension_numbers = #tpu.dot_dimension_numbers<[1], [0], [0], [1], [0, 0, 1, 1], [], []>} : vector<8x32xbf16>, vector<32x8xbf16>, vector<8x8xf32> -> vector<8x8xf32>
    %42 = vector.broadcast %39 : vector<1x8xf32> to vector<8x8xf32>
    %43 = arith.addf %41, %42 : vector<8x8xf32>
    %cst_25 = arith.constant 0.000000e+00 : f32
    %44 = vector.broadcast %cst_25 : f32 to vector<8x8xf32>
    %45 = arith.maximumf %43, %44 : vector<8x8xf32>
    %46 = vector.broadcast %cst_25 : f32 to vector<8x8xf32>
    %47 = arith.subf %43, %46 : vector<8x8xf32>
    %48 = arith.cmpf one, %47, %47 : vector<8x8xf32>
    %49 = vector.broadcast %cst_25 : f32 to vector<8x8xf32>
    %50 = arith.addf %43, %49 : vector<8x8xf32>
    %51 = math.absf %47 : vector<8x8xf32>
    %cst_26 = arith.constant 0.000000e+00 : f32
    %52 = vector.broadcast %cst_26 : f32 to vector<8x8xf32>
    %53 = arith.subf %52, %51 : vector<8x8xf32>
    %54 = math.exp %53 : vector<8x8xf32>
    %55 = math.log1p %54 : vector<8x8xf32>
    %56 = arith.addf %45, %55 : vector<8x8xf32>
    %57 = arith.select %48, %50, %56 : vector<8x8xi1>, vector<8x8xf32>
    %cst_27 = arith.constant 1.000000e-07 : f32
    %58 = vector.broadcast %cst_27 : f32 to vector<8x8xf32>
    %59 = arith.maximumf %57, %58 : vector<8x8xf32>
    %cst_28 = arith.constant 1.000000e+00 : f32
    %60 = vector.broadcast %cst_28 : f32 to vector<8x8xf32>
    %61 = arith.divf %60, %59 : vector<8x8xf32>
    %cst_29 = arith.constant dense<0.000000e+00> : vector<8xf32>
    %62 = vector.multi_reduction <add>, %61, %cst_29 [0] : vector<8x8xf32> to vector<8xf32>
    %63 = vector.shape_cast %62 : vector<8xf32> to vector<1x8xf32>
    %64 = arith.mulf %36, %61 : vector<8x8xf32>
    %cst_30 = arith.constant dense<0.000000e+00> : vector<8xf32>
    %65 = vector.multi_reduction <add>, %64, %cst_30 [0] : vector<8x8xf32> to vector<8xf32>
    %66 = vector.shape_cast %65 : vector<8xf32> to vector<1x8xf32>
    %cst_31 = arith.constant 1.000000e+00 : f32
    %67 = vector.broadcast %cst_31 : f32 to vector<1x8xf32>
    %68 = arith.divf %67, %63 : vector<1x8xf32>
    %69 = arith.mulf %68, %66 : vector<1x8xf32>
    %70 = math.sqrt %68 : vector<1x8xf32>
    %c0_32 = arith.constant 0 : index
    %c0_33 = arith.constant 0 : index
    %c0_34 = arith.constant 0 : index
    %71 = vector.load %arg3[%c0_32, %c0_33, %c0_34] : memref<1x1x8xf32, #tpu.memory_space<vmem>>, vector<1x1x8xf32>
    %72 = vector.shape_cast %71 : vector<1x1x8xf32> to vector<1x8xf32>
    %73 = arith.mulf %70, %72 : vector<1x8xf32>
    %74 = arith.addf %69, %73 : vector<1x8xf32>
    %75 = vector.shape_cast %74 : vector<1x8xf32> to vector<1x8xf32>
    %76 = vector.broadcast %75 : vector<1x8xf32> to vector<4x8xf32>
    %c0_35 = arith.constant 0 : index
    %c0_36 = arith.constant 0 : index
    %c0_37 = arith.constant 0 : index
    %77 = vector.load %arg14[%c0_35, %c0_36, %c0_37] : memref<1x4x8xf32, #tpu.memory_space<vmem>>, vector<1x4x8xf32>
    %78 = vector.shape_cast %77 : vector<1x4x8xf32> to vector<4x8xf32>
    %79 = vector.shape_cast %76 : vector<4x8xf32> to vector<1x4x8xf32>
    tpu.vector_store %arg14[%c0_35, %c0_36, %c0_37], %79 {strides = array<i32>} : memref<1x4x8xf32, #tpu.memory_space<vmem>>, vector<1x4x8xf32>,
    %c0_38 = arith.constant 0 : index
    %c0_39 = arith.constant 0 : index
    %c0_40 = arith.constant 0 : index
    %80 = vector.load %arg2[%c0_38, %c0_39, %c0_40] : memref<1x4x11xf32, #tpu.memory_space<vmem>>, vector<1x4x11xf32>
    %81 = vector.shape_cast %80 : vector<1x4x11xf32> to vector<4x11xf32>
    %82 = arith.truncf %74 : vector<1x8xf32> to vector<1x8xbf16>
    %c2 = arith.constant 2 : index
    %c0_41 = arith.constant 0 : index
    %c0_42 = arith.constant 0 : index
    %83 = vector.load %arg5[%c2, %c0_41, %c0_42] : memref<3x16x32xbf16, #tpu.memory_space<vmem>>, vector<1x16x32xbf16>
    %84 = vector.shape_cast %83 : vector<1x16x32xbf16> to vector<16x32xbf16>
    %85 = vector.extract_strided_slice %84 {offsets = [0, 0], sizes = [8, 32], strides = [1, 1]} : vector<16x32xbf16> to vector<8x32xbf16>
    %cst_43 = arith.constant dense<0.000000e+00> : vector<1x32xf32>
    %86 = tpu.matmul %82, %85, %cst_43 {dimension_numbers = #tpu.dot_dimension_numbers<[1], [0], [0], [1], [0, 0, 1, 1], [], []>} : vector<1x8xbf16>, vector<8x32xbf16>, vector<1x32xf32> -> vector<1x32xf32>
    %c1_44 = arith.constant 1 : index
    %c0_45 = arith.constant 0 : index
    %c0_46 = arith.constant 0 : index
    %87 = vector.load %arg5[%c1_44, %c0_45, %c0_46] : memref<3x16x32xbf16, #tpu.memory_space<vmem>>, vector<1x16x32xbf16>
    %88 = vector.shape_cast %87 : vector<1x16x32xbf16> to vector<16x32xbf16>
    %89 = vector.extract_strided_slice %88 {offsets = [0, 0], sizes = [11, 32], strides = [1, 1]} : vector<16x32xbf16> to vector<11x32xbf16>
    %90 = vector.extract_strided_slice %0 {offsets = [5, 0], sizes = [1, 32], strides = [1, 1]} : vector<9x32xf32> to vector<1x32xf32>
    %91 = arith.truncf %81 : vector<4x11xf32> to vector<4x11xbf16>
    %cst_47 = arith.constant dense<0.000000e+00> : vector<4x32xf32>
    %92 = tpu.matmul %91, %89, %cst_47 {dimension_numbers = #tpu.dot_dimension_numbers<[1], [0], [0], [1], [0, 0, 1, 1], [], []>} : vector<4x11xbf16>, vector<11x32xbf16>, vector<4x32xf32> -> vector<4x32xf32>
    %93 = vector.broadcast %90 : vector<1x32xf32> to vector<4x32xf32>
    %94 = arith.addf %92, %93 : vector<4x32xf32>
    %95 = vector.broadcast %86 : vector<1x32xf32> to vector<4x32xf32>
    %96 = arith.addf %94, %95 : vector<4x32xf32>
    %cst_48 = arith.constant 0.000000e+00 : f32
    %97 = vector.broadcast %cst_48 : f32 to vector<4x32xf32>
    %98 = arith.maximumf %96, %97 : vector<4x32xf32>
    %c2_49 = arith.constant 2 : index
    %c0_50 = arith.constant 0 : index
    %c0_51 = arith.constant 0 : index
    %99 = vector.load %arg6[%c2_49, %c0_50, %c0_51] : memref<3x32x32xbf16, #tpu.memory_space<vmem>>, vector<1x32x32xbf16>
    %100 = vector.shape_cast %99 : vector<1x32x32xbf16> to vector<32x32xbf16>
    %101 = vector.extract_strided_slice %0 {offsets = [6, 0], sizes = [1, 32], strides = [1, 1]} : vector<9x32xf32> to vector<1x32xf32>
    %102 = arith.truncf %98 : vector<4x32xf32> to vector<4x32xbf16>
    %cst_52 = arith.constant dense<0.000000e+00> : vector<4x32xf32>
    %103 = tpu.matmul %102, %100, %cst_52 {dimension_numbers = #tpu.dot_dimension_numbers<[1], [0], [0], [1], [0, 0, 1, 1], [], []>} : vector<4x32xbf16>, vector<32x32xbf16>, vector<4x32xf32> -> vector<4x32xf32>
    %104 = vector.broadcast %101 : vector<1x32xf32> to vector<4x32xf32>
    %105 = arith.addf %103, %104 : vector<4x32xf32>
    %cst_53 = arith.constant 0.000000e+00 : f32
    %106 = vector.broadcast %cst_53 : f32 to vector<4x32xf32>
    %107 = arith.maximumf %105, %106 : vector<4x32xf32>
    %c2_54 = arith.constant 2 : index
    %c0_55 = arith.constant 0 : index
    %c0_56 = arith.constant 0 : index
    %108 = vector.load %arg7[%c2_54, %c0_55, %c0_56] : memref<4x32x8xbf16, #tpu.memory_space<vmem>>, vector<1x32x8xbf16>
    %109 = vector.shape_cast %108 : vector<1x32x8xbf16> to vector<32x8xbf16>
    %110 = vector.extract_strided_slice %109 {offsets = [0, 0], sizes = [32, 4], strides = [1, 1]} : vector<32x8xbf16> to vector<32x4xbf16>
    %111 = vector.extract_strided_slice %0 {offsets = [7, 0], sizes = [1, 4], strides = [1, 1]} : vector<9x32xf32> to vector<1x4xf32>
    %112 = arith.truncf %107 : vector<4x32xf32> to vector<4x32xbf16>
    %cst_57 = arith.constant dense<0.000000e+00> : vector<4x4xf32>
    %113 = tpu.matmul %112, %110, %cst_57 {dimension_numbers = #tpu.dot_dimension_numbers<[1], [0], [0], [1], [0, 0, 1, 1], [], []>} : vector<4x32xbf16>, vector<32x4xbf16>, vector<4x4xf32> -> vector<4x4xf32>
    %114 = vector.broadcast %111 : vector<1x4xf32> to vector<4x4xf32>
    %115 = arith.addf %113, %114 : vector<4x4xf32>
    %c3 = arith.constant 3 : index
    %c0_58 = arith.constant 0 : index
    %c0_59 = arith.constant 0 : index
    %116 = vector.load %arg7[%c3, %c0_58, %c0_59] : memref<4x32x8xbf16, #tpu.memory_space<vmem>>, vector<1x32x8xbf16>
    %117 = vector.shape_cast %116 : vector<1x32x8xbf16> to vector<32x8xbf16>
    %118 = vector.extract_strided_slice %117 {offsets = [0, 0], sizes = [32, 4], strides = [1, 1]} : vector<32x8xbf16> to vector<32x4xbf16>
    %119 = vector.extract_strided_slice %0 {offsets = [8, 0], sizes = [1, 4], strides = [1, 1]} : vector<9x32xf32> to vector<1x4xf32>
    %120 = arith.truncf %107 : vector<4x32xf32> to vector<4x32xbf16>
    %cst_60 = arith.constant dense<0.000000e+00> : vector<4x4xf32>
    %121 = tpu.matmul %120, %118, %cst_60 {dimension_numbers = #tpu.dot_dimension_numbers<[1], [0], [0], [1], [0, 0, 1, 1], [], []>} : vector<4x32xbf16>, vector<32x4xbf16>, vector<4x4xf32> -> vector<4x4xf32>
    %122 = vector.broadcast %119 : vector<1x4xf32> to vector<4x4xf32>
    %123 = arith.addf %121, %122 : vector<4x4xf32>
    %cst_61 = arith.constant -2.000000e+01 : f32
    %cst_62 = arith.constant 2.000000e+00 : f32
    %124 = vector.broadcast %cst_61 : f32 to vector<4x4xf32>
    %125 = arith.maximumf %124, %123 : vector<4x4xf32>
    %126 = vector.broadcast %cst_62 : f32 to vector<4x4xf32>
    %127 = arith.minimumf %126, %125 : vector<4x4xf32>
    %128 = math.exp %127 : vector<4x4xf32>
    %c0_63 = arith.constant 0 : index
    %c0_64 = arith.constant 0 : index
    %c0_65 = arith.constant 0 : index
    %129 = vector.load %arg4[%c0_63, %c0_64, %c0_65] : memref<1x4x4xf32, #tpu.memory_space<vmem>>, vector<1x4x4xf32>
    %130 = vector.shape_cast %129 : vector<1x4x4xf32> to vector<4x4xf32>
    %131 = arith.mulf %128, %130 : vector<4x4xf32>
    %132 = arith.addf %115, %131 : vector<4x4xf32>
    %133 = math.tanh %132 : vector<4x4xf32>
    %cst_66 = arith.constant -5.000000e-01 : f32
    %134 = vector.broadcast %cst_66 : f32 to vector<4x4xf32>
    %135 = arith.mulf %134, %130 : vector<4x4xf32>
    %136 = arith.mulf %135, %130 : vector<4x4xf32>
    %137 = arith.subf %136, %127 : vector<4x4xf32>
    %cst_67 = arith.constant 0.918938517 : f32
    %138 = vector.broadcast %cst_67 : f32 to vector<4x4xf32>
    %139 = arith.subf %137, %138 : vector<4x4xf32>
    %140 = arith.mulf %133, %133 : vector<4x4xf32>
    %cst_68 = arith.constant 1.000000e+00 : f32
    %141 = vector.broadcast %cst_68 : f32 to vector<4x4xf32>
    %142 = arith.subf %141, %140 : vector<4x4xf32>
    %cst_69 = arith.constant 9.99999997E-7 : f32
    %143 = vector.broadcast %cst_69 : f32 to vector<4x4xf32>
    %144 = arith.addf %142, %143 : vector<4x4xf32>
    %145 = math.log %144 : vector<4x4xf32>
    %146 = arith.subf %139, %145 : vector<4x4xf32>
    %cst_70 = arith.constant dense<0.000000e+00> : vector<4xf32>
    %147 = vector.multi_reduction <add>, %146, %cst_70 [1] : vector<4x4xf32> to vector<4xf32>
    %148 = vector.shape_cast %147 : vector<4xf32> to vector<4x1xf32>
    %c0_71 = arith.constant 0 : index
    %c0_72 = arith.constant 0 : index
    %c0_73 = arith.constant 0 : index
    %149 = vector.load %arg9[%c0_71, %c0_72, %c0_73] : memref<1x4x4xf32, #tpu.memory_space<vmem>>, vector<1x4x4xf32>
    %150 = vector.shape_cast %149 : vector<1x4x4xf32> to vector<4x4xf32>
    %151 = vector.shape_cast %133 : vector<4x4xf32> to vector<1x4x4xf32>
    tpu.vector_store %arg9[%c0_71, %c0_72, %c0_73], %151 {strides = array<i32>} : memref<1x4x4xf32, #tpu.memory_space<vmem>>, vector<1x4x4xf32>,
    %c0_74 = arith.constant 0 : index
    %c0_75 = arith.constant 0 : index
    %c0_76 = arith.constant 0 : index
    %152 = vector.load %arg10[%c0_74, %c0_75, %c0_76] : memref<1x4x4xf32, #tpu.memory_space<vmem>>, vector<1x4x4xf32>
    %153 = vector.shape_cast %152 : vector<1x4x4xf32> to vector<4x4xf32>
    %154 = vector.shape_cast %115 : vector<4x4xf32> to vector<1x4x4xf32>
    tpu.vector_store %arg10[%c0_74, %c0_75, %c0_76], %154 {strides = array<i32>} : memref<1x4x4xf32, #tpu.memory_space<vmem>>, vector<1x4x4xf32>,
    %c0_77 = arith.constant 0 : index
    %c0_78 = arith.constant 0 : index
    %c0_79 = arith.constant 0 : index
    %155 = vector.load %arg11[%c0_77, %c0_78, %c0_79] : memref<1x4x4xf32, #tpu.memory_space<vmem>>, vector<1x4x4xf32>
    %156 = vector.shape_cast %155 : vector<1x4x4xf32> to vector<4x4xf32>
    %157 = vector.shape_cast %127 : vector<4x4xf32> to vector<1x4x4xf32>
    tpu.vector_store %arg11[%c0_77, %c0_78, %c0_79], %157 {strides = array<i32>} : memref<1x4x4xf32, #tpu.memory_space<vmem>>, vector<1x4x4xf32>,
    %c0_80 = arith.constant 0 : index
    %c0_81 = arith.constant 0 : index
    %c0_82 = arith.constant 0 : index
    %158 = vector.load %arg12[%c0_80, %c0_81, %c0_82] : memref<1x4x1xf32, #tpu.memory_space<vmem>>, vector<1x4x1xf32>
    %159 = vector.shape_cast %158 : vector<1x4x1xf32> to vector<4x1xf32>
    %160 = vector.shape_cast %148 : vector<4x1xf32> to vector<1x4x1xf32>
    tpu.vector_store %arg12[%c0_80, %c0_81, %c0_82], %160 {strides = array<i32>} : memref<1x4x1xf32, #tpu.memory_space<vmem>>, vector<1x4x1xf32>,
    %c0_83 = arith.constant 0 : index
    %c0_84 = arith.constant 0 : index
    %c0_85 = arith.constant 0 : index
    %161 = vector.load %arg13[%c0_83, %c0_84, %c0_85] : memref<1x4x4xf32, #tpu.memory_space<vmem>>, vector<1x4x4xf32>
    %162 = vector.shape_cast %161 : vector<1x4x4xf32> to vector<4x4xf32>
    %163 = vector.shape_cast %132 : vector<4x4xf32> to vector<1x4x4xf32>
    tpu.vector_store %arg13[%c0_83, %c0_84, %c0_85], %163 {strides = array<i32>} : memref<1x4x4xf32, #tpu.memory_space<vmem>>, vector<1x4x4xf32>,
    return
  }
  func.func @transform_0(%arg0: i32) -> (i32, i32, i32) {
    %c0_i32 = arith.constant 0 : i32
    %c0_i32_0 = arith.constant 0 : i32
    %c0_i32_1 = arith.constant 0 : i32
    return %arg0, %c0_i32, %c0_i32_0 : i32, i32, i32
  }
  func.func @transform_1(%arg0: i32) -> (i32, i32, i32) {
    %c0_i32 = arith.constant 0 : i32
    %c0_i32_0 = arith.constant 0 : i32
    %c0_i32_1 = arith.constant 0 : i32
    return %arg0, %c0_i32, %c0_i32_0 : i32, i32, i32
  }
  func.func @transform_2(%arg0: i32) -> (i32, i32, i32) {
    %c0_i32 = arith.constant 0 : i32
    %c0_i32_0 = arith.constant 0 : i32
    %c0_i32_1 = arith.constant 0 : i32
    return %arg0, %c0_i32, %c0_i32_0 : i32, i32, i32
  }
  func.func @transform_3(%arg0: i32) -> (i32, i32, i32) {
    %c0_i32 = arith.constant 0 : i32
    %c0_i32_0 = arith.constant 0 : i32
    %c0_i32_1 = arith.constant 0 : i32
    return %arg0, %c0_i32, %c0_i32_0 : i32, i32, i32
  }
  func.func @transform_4(%arg0: i32) -> (i32, i32, i32) {
    %c0_i32 = arith.constant 0 : i32
    %c0_i32_0 = arith.constant 0 : i32
    %c0_i32_1 = arith.constant 0 : i32
    %c0_i32_2 = arith.constant 0 : i32
    return %c0_i32, %c0_i32_0, %c0_i32_1 : i32, i32, i32
  }
  func.func @transform_5(%arg0: i32) -> (i32, i32, i32) {
    %c0_i32 = arith.constant 0 : i32
    %c0_i32_0 = arith.constant 0 : i32
    %c0_i32_1 = arith.constant 0 : i32
    %c0_i32_2 = arith.constant 0 : i32
    return %c0_i32, %c0_i32_0, %c0_i32_1 : i32, i32, i32
  }
  func.func @transform_6(%arg0: i32) -> (i32, i32, i32) {
    %c0_i32 = arith.constant 0 : i32
    %c0_i32_0 = arith.constant 0 : i32
    %c0_i32_1 = arith.constant 0 : i32
    %c0_i32_2 = arith.constant 0 : i32
    return %c0_i32, %c0_i32_0, %c0_i32_1 : i32, i32, i32
  }
  func.func @transform_7(%arg0: i32) -> (i32, i32) {
    %c0_i32 = arith.constant 0 : i32
    %c0_i32_0 = arith.constant 0 : i32
    %c0_i32_1 = arith.constant 0 : i32
    return %c0_i32, %c0_i32_0 : i32, i32
  }
  func.func @transform_8(%arg0: i32) -> (i32, i32, i32) {
    %c0_i32 = arith.constant 0 : i32
    %c0_i32_0 = arith.constant 0 : i32
    %c0_i32_1 = arith.constant 0 : i32
    return %arg0, %c0_i32, %c0_i32_0 : i32, i32, i32
  }
  func.func @transform_9(%arg0: i32) -> (i32, i32, i32) {
    %c0_i32 = arith.constant 0 : i32
    %c0_i32_0 = arith.constant 0 : i32
    %c0_i32_1 = arith.constant 0 : i32
    return %arg0, %c0_i32, %c0_i32_0 : i32, i32, i32
  }
  func.func @transform_10(%arg0: i32) -> (i32, i32, i32) {
    %c0_i32 = arith.constant 0 : i32
    %c0_i32_0 = arith.constant 0 : i32
    %c0_i32_1 = arith.constant 0 : i32
    return %arg0, %c0_i32, %c0_i32_0 : i32, i32, i32
  }
  func.func @transform_11(%arg0: i32) -> (i32, i32, i32) {
    %c0_i32 = arith.constant 0 : i32
    %c0_i32_0 = arith.constant 0 : i32
    %c0_i32_1 = arith.constant 0 : i32
    return %arg0, %c0_i32, %c0_i32_0 : i32, i32, i32
  }
  func.func @transform_12(%arg0: i32) -> (i32, i32, i32) {
    %c0_i32 = arith.constant 0 : i32
    %c0_i32_0 = arith.constant 0 : i32
    %c0_i32_1 = arith.constant 0 : i32
    return %arg0, %c0_i32, %c0_i32_0 : i32, i32, i32
  }
  func.func @transform_13(%arg0: i32) -> (i32, i32, i32) {
    %c0_i32 = arith.constant 0 : i32
    %c0_i32_0 = arith.constant 0 : i32
    %c0_i32_1 = arith.constant 0 : i32
    return %arg0, %c0_i32, %c0_i32_0 : i32, i32, i32
  }
}

</mosaic_0001>

<bundles_post_ra>
// kernel: pearl_agent_forward.3
= control target key start
LH: loop header
LB: loop body
LE: loop exit
PB: predicated region body
PF: predicated region fallthrough
CT: control target
= control target key end

     0   :  { %s2170_s0 = inlined_call_operand.vmem [shape: f32[2,8,16], index: 0, kind: input, shape index: {}]   ;;  %s2171_s1 = inlined_call_operand.vmem [shape: f32[2,4,11], index: 1, kind: input, shape index: {}]   ;;  %s2172_s2 = inlined_call_operand.vmem [shape: f32[2,1,8], index: 2, kind: input, shape index: {}]   ;;  %s2173_s3 = inlined_call_operand.vmem [shape: f32[2,4,4], index: 3, kind: input, shape index: {}]   ;;  %s2174_s4 = inlined_call_operand.vmem [shape: bf16[3,16,32], index: 4, kind: input, shape index: {}]   ;;  %s2175_s5 = inlined_call_operand.vmem [shape: bf16[3,32,32], index: 5, kind: input, shape index: {}]   ;;  %s2176_s6 = inlined_call_operand.vmem [shape: bf16[4,32,8], index: 6, kind: input, shape index: {}]   ;;  %s2177_s7 = inlined_call_operand.vmem [shape: f32[9,32], index: 7, kind: input, shape index: {}]   ;;  %s2178_s8 = inlined_call_operand.vmem [shape: f32[2,4,4], index: 8, kind: output, shape index: {0}]   ;;  %s2179_s9 = inlined_call_operand.vmem [shape: f32[2,4,4], index: 9, kind: output, shape index: {1}]   ;;  %s2180_s10 = inlined_call_operand.vmem [shape: f32[2,4,4], index: 10, kind: output, shape index: {2}]   ;;  %s2181_s11 = inlined_call_operand.vmem [shape: f32[2,4,1], index: 11, kind: output, shape index: {3}]   ;;  %s2182_s12 = inlined_call_operand.vmem [shape: f32[2,4,4], index: 12, kind: output, shape index: {4}]   ;;  %s2183_s13 = inlined_call_operand.hbm [shape: f32[2,4,8], index: 13, kind: output, shape index: {5}]  }
   0x1   :  { %2186 = sst [smem:[#allocation6_spill]] %s2170_s0 }
   0x2   :  { %2187 = sst [smem:[#allocation7_spill]] %s2171_s1 }
   0x3   :  { %2188 = sst [smem:[#allocation8_spill]] %s2172_s2 }
   0x4   :  { %2189 = sst [smem:[#allocation9_spill]] %s2173_s3 }
   0x5   :  { %2190 = sst [smem:[#allocation10_spill]] %s2174_s4 }
   0x6   :  { %19 = vsyncpa [#allocation3], 0 }
   0x7   :  { %21 = vsyncpa [#allocation3 + $0x1], 0  ;;  %s1893_s25 = smov 0   ;;  %s1895_s26 = smov 0  }
   0x8   :  { %s1897_s27 = smov 0   ;;  %s1899_s28 = smov 0  }
   0x9 LB: > { %s1914_s29 = sadd.s32 4294967295, %s1817_s28   ;;  %s1512_s30 = sadd.s32 4294967294, %s1817_s28   ;;  %s1817_s28 = sphi %s1899_s28, %s2205_s28   ;;  %s1813_s27 = sphi %s1897_s27, %s2204_s27   ;;  %s1809_s26 = sphi %s1895_s26, %s2203_s26   ;;  %s1805_s25 = sphi %s1893_s25, %s2202_s25  }
   0xa   : > { %s1918_s14 = sadd.s32 1, %s1817_s28   ;;  %s352_s15 = sadd.s32 1, %s1813_s27 }
   0xb   : > { %s349_s16 = ssub.s32 %s1817_s28, %s1918_s14  ;;  %p362_p0 = scmp.ne.s32.totalorder %s1813_s27, %s1809_s26 }
   0xc   : > { %p350_p1 = scmp.eq.s32.totalorder %s349_s16, 0  ;;  %p363_p2 = scmp.eq.s32.totalorder %s1914_s29, 1 }
   0xd   : > { %p368_p3 = scmp.ne.s32.totalorder %s1809_s26, %s1805_s25  ;;  %p369_p4 = scmp.eq.s32.totalorder %s1512_s30, 1 }
   0xe   : > { %s1929_s17 = scalar_select %p350_p1, %s1813_s27, %s352_s15  }
   0xf   : > { %p1931_p5 = por %p363_p2, %p362_p0  ;;  %p1935_p6 = por %p369_p4, %p368_p3 }
  0x10   : > { %2191 = sst [smem:[#allocation5_spill]] %s1929_s17  ;;  %p1515_p7 = scmp.ge.s32.totalorder %s1817_s28, 1 }
  0x11   : > { %p426_p8 = scmp.lt.s32.totalorder %s1817_s28, 3 }
  0x13   : > { %p427_p9 = pnand %p1515_p7, %p426_p8 }
  0x14   : > { %s2194_s4 = sld [smem:[#allocation10_spill]] (!%p427_p9)  ;;  %v1819_v1 = vmov (!%p427_p9), 0.0   ;;  %p500_p10 = scmp.lt.s32.totalorder (!%p427_p9), %s1914_s29, 1  ;;  %vm1820_vm0 = vmmov (!%p427_p9), 0   ;;  %vm552_vm1 = vcmask (!%p427_p9), 130048   ;;  %v1724_v4 = vld [vmem:[%s2175_s5] sm:$0xff] (!%p427_p9)   ;;  %v542_v7 = vlaneseq (!%p427_p9) }
  0x15   : > { %430 = sbr.rel (%p427_p9) target bundleno = 1846 (0x736), region = 52  ;;  %1607 = vmatprep.subr.bf16.mxu0 (!%p427_p9), %v1819_v1  ;;  %1613 = vmatprep.subr.bf16.mxu1 (!%p427_p9), %v1819_v1  ;;  %s2195_s0 = sld [smem:[#allocation6_spill]] (!%p427_p9)  ;;  %v1725_v5 = vld [vmem:[%s2175_s5 + $0x8] sm:$0xff] (!%p427_p9)   ;;  %v1726_v6 = vld [vmem:[%s2175_s5 + $0x10] sm:$0xff] (!%p427_p9)   ;;  %v1981_v10 = vld [vmem:[%s2177_s7] sm:$0xff] (!%p427_p9)  ;;  %vm618_vm2 = vcmask (!%p427_p9), 261120  }
  0x16   : > { %1609 = vmatprep.mubr.msk.bf16.mxu0 (!%p427_p9), %vm1820_vm0, %v1819_v1  ;;  %1617 = vmatprep.mubr.msk.bf16.mxu1 (!%p427_p9), %vm1820_vm0, %v1819_v1  ;;  %v1973_v8 = vshrl.u32 (!%p427_p9), %v542_v7, 7  ;;  %v1727_v19 = vld [vmem:[%s2175_s5 + $0x18] sm:$0xff] (!%p427_p9)   ;;  %v1728_v28 = vld [vmem:[%s2176_s6 + $0x10] sm:$0xff] (!%p427_p9)   ;;  %v1729_v30 = vld [vmem:[%s2176_s6] sm:$0xff] (!%p427_p9)   ;;  %vm917_vm3 = vcmask (!%p427_p9), 1043456   ;;  %vm978_vm4 = vcmask (!%p427_p9), 1044480  }
  0x17   : > { %1614 = vmatpush3.bf16.msra.mxu1 (!%p427_p9), %v1724_v4  ;;  %v1730_v31 = vld [vmem:[%s2176_s6 + $0x18] sm:$0xff] (!%p427_p9)   ;;  %v1731_v32 = vld [vmem:[%s2176_s6 + $0x8] sm:$0xff] (!%p427_p9)   ;;  %vm979_vm5 = vcmask (!%p427_p9), 1045504   ;;  %s2196_s1 = sld [smem:[#allocation7_spill]] (!%p427_p9)  ;;  %v1821_v45 = vmov (!%p427_p9), 65535   ;;  %vm974_vm6 = vcmask (!%p427_p9), 89088  }
  0x18   : > { %1615 = vmatprep.subr.bf16.mxu1 (!%p427_p9), %v1819_v1  ;;  %v1976_v9 = vsub.s32 (!%p427_p9), 0, %v1973_v8  ;;  %v604_v20 = vsub.s32 (!%p427_p9), 1, %v1973_v8  ;;  %v671_v33 = vsub.s32 (!%p427_p9), 2, %v1973_v8  ;;  %v980_v46 = vsel (!%p427_p9), %vm978_vm4, 4294967295, %v1821_v45  ;;  %s2197_s2 = sld [smem:[#allocation8_spill]] (!%p427_p9)  ;;  %s2184_s30 = sand.u32 (!%p427_p9), 1, %s1809_s26  }
  0x19   : > { %v981_v48 = vsel (!%p427_p9), %vm979_vm5, %v980_v46, 0  ;;  %v800_v51 = vsub.s32 (!%p427_p9), 4, %v1973_v8  ;;  %vm875_vm9 = vcmask (!%p427_p9), 64512   ;;  %vm908_vm12 = vcmask (!%p427_p9), 60416   ;;  %s2198_s3 = sld [smem:[#allocation9_spill]] (!%p427_p9)  ;;  %s2200_s17 = sand.u32 (!%p427_p9), 1, %s1809_s26  }
  0x1a   : > { %v1723_v0 = vld [vmem:[%s2194_s4] sm:$0xff] (!%p427_p9)   ;;  %v545_v11 = vrot.slane (!%p427_p9), %v1981_v10, %v1976_v9  ;;  %v605_v21 = vrot.slane (!%p427_p9), %v1981_v10, %v604_v20  ;;  %v672_v34 = vrot.slane (!%p427_p9), %v1981_v10, %v671_v33  ;;  %v1547_v42 = vld [vmem:[%s2194_s4 + $0x10] sm:$0xf] (!%p427_p9)  ;;  %v1732_v43 = vld [vmem:[%s2194_s4 + $0x8] sm:$0xff] (!%p427_p9)   ;;  %vm1241_vm13 = vcmask (!%p427_p9), 27648  }
  0x1b   : > { %1608 = vmatpush3.bf16.msra.mxu0 (!%p427_p9), %v1723_v0  ;;  %1616 = vmatpush3.bf16.msra.mxu1 (!%p427_p9), %v1725_v5  ;;  %v919_v44 = vsel (!%p427_p9), %vm917_vm3, %v1547_v42, 0  ;;  %v983_v49 = vand.u32 (!%p427_p9), %v1732_v43, %v981_v48  ;;  %v801_v52 = vrot.slane (!%p427_p9), %v1981_v10, %v800_v51 }
  0x1c   : > { %s1950_s22 = scalar_select %p500_p10, %s1914_s29, 1  ;;  %1621 = vmatprep.subr.bf16.mxu0 %v1819_v1  ;;  %1629 = vmatprep.subr.bf16.mxu1 %v1819_v1 }
  0x1e   : > { %s1517_s23 = sshll.u32 %s1950_s22, 3  ;;  %s2022_s20 = sshll.u32 %s1950_s22, 2 }
  0x1f   : > { %s503_s15 = scalar_lea.vmem %s2195_s0, %s1517_s23  ;;  %s507_s16 = scalar_lea.vmem %s2196_s1, %s2022_s20 }
  0x20   : > { %v538_v2 = vld [vmem:[%s503_s15] sm:$0xff]  ;;  %s510_s24 = scalar_lea.vmem %s2197_s2, %s1950_s22  ;;  %s2051_s15 = sshll.u32 %s2184_s30, 2 }
  0x21   : > { %v541_v3 = vpack.c.bf16 %v538_v2, %v538_v2  ;;  %v910_v47 = vld [vmem:[%s507_s16] sm:$0xf]  ;;  %s2185_s22 = scalar_lea.vmem [#allocation2], %s2051_s15  ;;  %s526_s16 = scalar_lea.vmem %s2180_s10, %s2022_s20 }
  0x22   : > { %v964_v50 = vpack.c.bf16 %v910_v47, %v910_v47  ;;  %v901_v42 = vld [vmem:[%s510_s24] sm:$0x1]  ;;  %s522_s24 = scalar_lea.vmem %s2179_s9, %s2022_s20  ;;  %s534_s1 = scalar_lea.vmem %s2182_s12, %s2022_s20 }
  0x23   : > { %1610 = vmatmul.mubr.msk.bf16.vlgmr.msra.gmra.mrb[0].mxu0 %vm552_vm1, %v541_v3  ;;  %s1577_s0 = sshll.u32 %s1914_s29, 6  ;;  %s1272_s30 = scalar_lea.sflag [#allocation3], %s2200_s17 }
  0x24   : > { %1625 = vmatprep.mubr.msk.bf16.mxu0 %vm1820_vm0, %v1819_v1  ;;  %1622 = vmatpush3.bf16.msra.mxu0 %v1726_v6  ;;  %s1822_s2 = smov [#allocation2]  }
  0x25   : > { %1623 = vmatprep.subr.bf16.mxu0 %v1819_v1 }
  0x28   : > { %1624 = vmatpush3.bf16.msra.mxu0 %v1727_v19 }
  0x29   : > { %1637 = vmatprep.subr.bf16.mxu0 %v1819_v1 }
  0xf6   : > { %v590_v12 = vpop.f32.mrb[0].mxu0 }
  0xf7   : > { %v591_v13 = vadd.f32 %v590_v12, %v545_v11  ;;  %v1611_v14 = vpop.f32.mrb[1].mxu0 }
  0xf8   : > { %v593_v15 = vpop.f32.mrb[2].mxu0 }
  0xf9   : > { %v596_v16 = vmax.f32 %v591_v13, 0.0  ;;  %v1612_v17 = vpop.f32.mrb[3].mxu0 }
  0xfb   : > { %v601_v18 = vpack.c.bf16 %v596_v16, %v596_v16 }
  0xfd   : > { %1618 = vmatmul.mubr.msk.bf16.vlgmr.msra.gmra.mrb[0].mxu1 %vm618_vm2, %v601_v18  ;;  %v736_v18 = vsub.s32 3, %v1973_v8 }
  0xfe   : > { %1633 = vmatprep.mubr.msk.bf16.mxu1 %vm1820_vm0, %v1819_v1  ;;  %1630 = vmatpush3.bf16.msra.mxu1 %v1729_v30 }
  0xff   : > { %1631 = vmatprep.subr.bf16.mxu1 %v1819_v1  ;;  %v737_v19 = vrot.slane %v1981_v10, %v736_v18 }
 0x102   : > { %1632 = vmatpush3.bf16.msra.mxu1 %v1731_v32 }
 0x103   : > { %1645 = vmatprep.subr.bf16.mxu1 %v1819_v1 }
 0x1d0   : > { %v656_v22 = vpop.f32.mrb[0].mxu1 }
 0x1d1   : > { %v657_v23 = vadd.f32 %v656_v22, %v605_v21  ;;  %v1619_v24 = vpop.f32.mrb[1].mxu1 }
 0x1d2   : > { %v659_v25 = vpop.f32.mrb[2].mxu1 }
 0x1d3   : > { %v662_v26 = vmax.f32 %v657_v23, 0.0  ;;  %v1620_v27 = vpop.f32.mrb[3].mxu1 }
 0x1d5   : > { %v668_v29 = vpack.c.bf16 %v662_v26, %v662_v26 }
 0x1d7   : > { %1626 = vmatmul.mubr.msk.bf16.vlgmr.msra.gmra.mrb[4].mxu0 %vm618_vm2, %v668_v29 }
 0x1d8   : > { %1638 = vmatpush3.bf16.msra.mxu0 %v1728_v28  ;;  %1641 = vmatprep.mubr.msk.bf16.mxu0 %vm1820_vm0, %v1819_v1 }
 0x1d9   : > { %1639 = vmatprep.subr.bf16.mxu0 %v1819_v1 }
 0x1dc   : > { %1640 = vmatpush3.bf16.msra.mxu0 %v1730_v31 }
 0x1dd   : > { %1651 = vmatprep.subr.bf16.mxu0 %v1819_v1 }
 0x2aa   : > { %v722_v35 = vpop.f32.mrb[4].mxu0 }
 0x2ab   : > { %v723_v36 = vadd.f32 %v722_v35, %v672_v34  ;;  %v1627_v37 = vpop.f32.mrb[5].mxu0 }
 0x2ac   : > { %v725_v38 = vpop.f32.mrb[6].mxu0 }
 0x2ad   : > { %v728_v39 = vmax.f32 %v723_v36, 0.0  ;;  %v1628_v40 = vpop.f32.mrb[7].mxu0 }
 0x2af   : > { %v733_v41 = vpack.c.bf16 %v728_v39, %v728_v39 }
 0x2b1   : > { %1634 = vmatmul.mubr.msk.bf16.vlgmr.msra.gmra.mrb[4].mxu1 %vm618_vm2, %v733_v41  ;;  %1642 = vmatmul.mubr.msk.bf16.vlgmr.msra.gmra.mrb[8].mxu0 %vm618_vm2, %v733_v41 }
 0x2b2   : > { %1653 = vmatprep.mubr.msk.bf16.mxu0 %vm1820_vm0, %v1819_v1  ;;  %1647 = vmatprep.mubr.msk.bf16.mxu1 %vm1820_vm0, %v1819_v1 }
 0x2b3   : > { %1646 = vmatpush3.bf16.msra.mxu1 %v919_v44  ;;  %1652 = vmatpush3.bf16.msra.mxu0 %v983_v49 }
 0x2b4   : > { %1657 = vmatprep.subr.bf16.mxu1 %v1819_v1  ;;  %1665 = vmatprep.subr.bf16.mxu0 %v1819_v1 }
 0x2b9   : > { %1654 = vmatmul.mubr.msk.bf16.vlgmr.msra.gmra.mrb[12].mxu0 %vm974_vm6, %v964_v50 }
 0x2ba   : > { %1669 = vmatprep.mubr.msk.bf16.mxu0 %vm1820_vm0, %v1819_v1 }
 0x384   : > { %v787_v53 = vpop.f32.mrb[4].mxu1  ;;  %v848_v54 = vpop.f32.mrb[8].mxu0 }
 0x385   : > { %v849_v55 = vadd.f32 %v848_v54, %v801_v52  ;;  %v1635_v56 = vpop.f32.mrb[5].mxu1  ;;  %v1643_v57 = vpop.f32.mrb[9].mxu0  ;;  %v788_v20 = vadd.f32 %v787_v53, %v737_v19  ;;  %v1733_v53 = vld [vmem:[%s2175_s5 + $0x20] sm:$0xff]   ;;  %v1734_v54 = vld [vmem:[%s2175_s5 + $0x28] sm:$0xff]  }
 0x386   : > { %v790_v58 = vpop.f32.mrb[6].mxu1  ;;  %v851_v59 = vpop.f32.mrb[10].mxu0  ;;  %v1571_v19 = vld [vmem:[%s2177_s7 + $0x8] ss:$0 sm:$0xff] }
 0x387   : > { %v857_v60 = vand.u32 2147483647, %v849_v55  ;;  %v1636_v61 = vpop.f32.mrb[7].mxu1  ;;  %v1644_v62 = vpop.f32.mrb[11].mxu0  ;;  %v854_v13 = vmax.f32 %v849_v55, 0.0  ;;  %vm855_vm8 = vcmp.ne.f32.partialorder %v849_v55, %v849_v55 }
 0x389   : > { %v858_v63 = vsub.f32 0.0, %v857_v60 }
 0x38b   : > { %v859_v0 = vmul.f32 1.442695, %v858_v63 }
 0x38c   : > { %v1019_v49 = vpop.f32.mrb[12].mxu0 }
 0x38d   : > { %1739 = vpow2.f32 %v859_v0  ;;  %v1655_v50 = vpop.f32.mrb[13].mxu0 }
 0x38e   : > { %v1022_v51 = vpop.f32.mrb[14].mxu0 }
 0x38f   : > { %v1656_v52 = vpop.f32.mrb[15].mxu0 }
 0x397   : > { %v1740_v2 = vpop.eup %1739 }
 0x398   : > { %v861_v3 = vadd.f32 1.0, %v1740_v2  ;;  %v864_v4 = vmul.f32 -0.5, %v1740_v2  ;;  %v867_v6 = vand.u32 2147483647, %v1740_v2 }
 0x39a   : > { %1741 = vlog2.f32 %v861_v3  ;;  %v865_v5 = vadd.f32 1.0, %v864_v4  ;;  %vm868_vm7 = vcmp.lt.f32.partialorder %v867_v6, 0.0004427343  ;;  %v1737_v4 = vld [vmem:[%s2176_s6 + $0x38] sm:$0xff]   ;;  %v1039_v6 = vsub.s32 6, %v1973_v8 }
 0x39c   : > { %v866_v12 = vmul.f32 %v1740_v2, %v865_v5  ;;  %v1735_v2 = vld [vmem:[%s2176_s6 + $0x30] sm:$0xff]   ;;  %v1738_v5 = vld [vmem:[%s2176_s6 + $0x28] sm:$0xff]  }
 0x3a4   : > { %v1742_v7 = vpop.eup %1741 }
 0x3a5   : > { %v863_v11 = vmul.f32 0.6931472, %v1742_v7  ;;  %v1040_v7 = vrot.slane %v1981_v10, %v1039_v6 }
 0x3a7   : > { %v869_v14 = vsel %vm868_vm7, %v866_v12, %v863_v11 }
 0x3a8   : > { %v870_v15 = vadd.f32 %v869_v14, %v854_v13 }
 0x3aa   : > { %v871_v16 = vsel %vm855_vm8, %v849_v55, %v870_v15  ;;  %v967_v55 = vsub.s32 5, %v1973_v8 }
 0x3ab   : > { %v872_v17 = vmax.f32 %v871_v16, 1e-07 }
 0x3ac   : > { %v968_v56 = vrot.slane %v1981_v10, %v967_v55 }
 0x3ad   : > { %1743 = vrcp.f32 %v872_v17  ;;  %v1105_v17 = vsub.s32 7, %v1973_v8 }
 0x3ae   : > { %v1020_v57 = vadd.f32 %v1019_v49, %v968_v56 }
 0x3af   : > { %v1106_v18 = vrot.slane %v1981_v10, %v1105_v17 }
 0x3b7   : > { %v1744_v21 = vpop.eup %1743 }
 0x3b8   : > { %v876_v22 = vsel %vm875_vm9, %v1744_v21, 0.0  ;;  %v883_v23 = vmul.f32 %v1744_v21, %v788_v20 }
 0x3b9   : > { %v877_v24 = vrot.slane %v876_v22, 4 }
 0x3ba   : > { %v884_v25 = vsel %vm875_vm9, %v883_v23, 0.0 }
 0x3bb   : > { %v878_v26 = vadd.f32 %v877_v24, %v876_v22  ;;  %v885_v27 = vrot.slane %v884_v25, 4 }
 0x3bd   : > { %v879_v28 = vrot.slane %v878_v26, 2  ;;  %v886_v29 = vadd.f32 %v885_v27, %v884_v25 }
 0x3bf   : > { %v880_v30 = vadd.f32 %v879_v28, %v878_v26  ;;  %v887_v32 = vrot.slane %v886_v29, 2 }
 0x3c1   : > { %v881_v31 = vrot.slane %v880_v30, 1  ;;  %v888_v34 = vadd.f32 %v887_v32, %v886_v29 }
 0x3c3   : > { %v882_v33 = vadd.f32 %v881_v31, %v880_v30  ;;  %v889_v35 = vrot.slane %v888_v34, 1 }
 0x3c5   : > { %1745 = vrcp.f32 %v882_v33  ;;  %v890_v36 = vadd.f32 %v889_v35, %v888_v34 }
 0x3cf   : > { %v1746_v37 = vpop.eup %1745 }
 0x3d0   : > { %v893_v38 = vmul.f32 %v1746_v37, %v890_v36  ;;  %1747 = vrsqrt.f32 %v1746_v37  ;;  %vm896_vm10 = vcmp.eq.f32.partialorder %v1746_v37, inf  ;;  %v899_v41 = vand.u32 2147483648, %v1746_v37 }
 0x3d1   : > { %vm898_vm11 = vcmp.eq.f32.partialorder %v1746_v37, 0.0 }
 0x3da   : > { %v1748_v39 = vpop.eup %1747 }
 0x3db   : > { %v895_v40 = vmul.f32 %v1748_v39, %v1746_v37 }
 0x3dd   : > { %v897_v43 = vsel %vm896_vm10, %v1746_v37, %v895_v40 }
 0x3de   : > { %v900_v44 = vsel %vm898_vm11, %v899_v41, %v897_v43 }
 0x3df   : > { %v902_v45 = vmul.f32 %v901_v42, %v900_v44 }
 0x3e1   : > { %v903_v46 = vadd.f32 %v902_v45, %v893_v38 }
 0x3e3   : > { %v911_v47 = vpack.c.bf16 %v903_v46, %v903_v46  ;;  %v907_v48 = vrot.slane %v903_v46, %v1976_v9 }
 0x3e5   : > { %1648 = vmatmul.mubr.msk.bf16.vlgmr.msra.gmra.mrb[8].mxu1 %vm875_vm9, %v911_v47  ;;  %909 = vst.msk [vmem:[%s2185_s22] sm:$0xf] %vm908_vm12, %v907_v48  ;;  %s514_s22 = scalar_lea.vmem %s2198_s3, %s2022_s20  ;;  %s1759_s3 = sshll.u32 %s1822_s2, 4  ;;  %s1760_s3 = int_to_ptr.vmem [resolvable:$false] %s1759_s3 }
 0x3e6   : > { %1661 = vmatprep.mubr.msk.bf16.mxu1 %vm1820_vm0, %v1819_v1  ;;  %1658 = vmatpush3.bf16.msra.mxu1 %v1733_v53  ;;  %v1227_v32 = vld [vmem:[%s514_s22] sm:$0xf]  ;;  %s1761_s4 = scalar_lea.vmem %s1760_s3, 128 }
 0x3e7   : > { %1659 = vmatprep.subr.bf16.mxu1 %v1819_v1  ;;  %v1231_v39 = vmul.f32 -0.5, %v1227_v32 }
 0x3e9   : > { %v1232_v40 = vmul.f32 %v1231_v39, %v1227_v32 }
 0x3ea   : > { %1660 = vmatpush3.bf16.msra.mxu1 %v1734_v54 }
 0x3eb   : > { %1673 = vmatprep.subr.bf16.mxu1 %v1819_v1 }
 0x4b8   : > { %v955_v58 = vpop.f32.mrb[8].mxu1 }
 0x4b9   : > { %v1028_v59 = vrot.slane %v955_v58, %v1976_v9  ;;  %v1649_v60 = vpop.f32.mrb[9].mxu1  ;;  %v1736_v9 = vld [vmem:[%s2176_s6 + $0x20] sm:$0xff]  }
 0x4ba   : > { %v958_v61 = vpop.f32.mrb[10].mxu1  ;;  %1666 = vmatpush3.bf16.msra.mxu0 %v1736_v9 }
 0x4bb   : > { %v1029_v62 = vadd.f32 %v1028_v59, %v1020_v57  ;;  %v1650_v63 = vpop.f32.mrb[11].mxu1  ;;  %1667 = vmatprep.subr.bf16.mxu0 %v1819_v1 }
 0x4bd   : > { %v1030_v0 = vmax.f32 %v1029_v62, 0.0 }
 0x4be   : > { %1668 = vmatpush3.bf16.msra.mxu0 %v1738_v5 }
 0x4bf   : > { %v1036_v3 = vpack.c.bf16 %v1030_v0, %v1030_v0 }
 0x4c1   : > { %1662 = vmatmul.mubr.msk.bf16.vlgmr.msra.gmra.mrb[12].mxu1 %vm618_vm2, %v1036_v3 }
 0x4c2   : > { %1674 = vmatpush3.bf16.msra.mxu1 %v1735_v2  ;;  %1677 = vmatprep.mubr.msk.bf16.mxu1 %vm1820_vm0, %v1819_v1 }
 0x4c3   : > { %1675 = vmatprep.subr.bf16.mxu1 %v1819_v1 }
 0x4c6   : > { %1676 = vmatpush3.bf16.msra.mxu1 %v1737_v4 }
 0x594   : > { %v1090_v11 = vpop.f32.mrb[12].mxu1 }
 0x595   : > { %v1091_v12 = vadd.f32 %v1090_v11, %v1040_v7  ;;  %v1663_v13 = vpop.f32.mrb[13].mxu1 }
 0x596   : > { %v1093_v14 = vpop.f32.mrb[14].mxu1 }
 0x597   : > { %v1096_v1 = vmax.f32 %v1091_v12, 0.0  ;;  %v1664_v15 = vpop.f32.mrb[15].mxu1 }
 0x599   : > { %v1102_v16 = vpack.c.bf16 %v1096_v1, %v1096_v1 }
 0x59b   : > { %1670 = vmatmul.mubr.msk.bf16.vlgmr.msra.gmra.mrb[16].mxu0 %vm618_vm2, %v1102_v16  ;;  %1678 = vmatmul.mubr.msk.bf16.vlgmr.msra.gmra.mrb[16].mxu1 %vm618_vm2, %v1102_v16 }
 0x66e   : > { %v1156_v20 = vpop.f32.mrb[16].mxu0  ;;  %v1217_v21 = vpop.f32.mrb[16].mxu1 }
 0x66f   : > { %v1157_v22 = vadd.f32 %v1156_v20, %v1106_v18  ;;  %v1218_v23 = vadd.f32 %v1571_v19, %v1217_v21  ;;  %v1671_v24 = vpop.f32.mrb[17].mxu0  ;;  %v1679_v25 = vpop.f32.mrb[17].mxu1 }
 0x670   : > { %v1159_v8 = vpop.f32.mrb[18].mxu0  ;;  %v1220_v10 = vpop.f32.mrb[18].mxu1 }
 0x671   : > { %1246 = vst.msk [vmem:[%s522_s24] sm:$0xf] %vm1241_vm13, %v1157_v22  ;;  %v1223_v26 = vmax.f32 %v1218_v23, -20.0  ;;  %v1672_v27 = vpop.f32.mrb[19].mxu0  ;;  %v1680_v28 = vpop.f32.mrb[19].mxu1  ;;  %s2128_s24 = scalar_lea.hbm %s2183_s13, %s1577_s0 }
 0x673   : > { %v1224_v29 = vmin.f32 %v1223_v26, 2.0 }
 0x675   : > { %v1225_v30 = vmul.f32 1.442695, %v1224_v29  ;;  %1247 = vst.msk [vmem:[%s526_s16] sm:$0xf] %vm1241_vm13, %v1224_v29  ;;  %s518_s16 = scalar_lea.vmem %s2178_s8, %s2022_s20  ;;  %v1233_v41 = vsub.f32 %v1232_v40, %v1224_v29 }
 0x677   : > { %1749 = vpow2.f32 %v1225_v30  ;;  %v1575_v43 = vadd.f32 -0.9189385, %v1233_v41 }
 0x681   : > { %v1750_v31 = vpop.eup %1749 }
 0x682   : > { %v1228_v33 = vmul.f32 %v1750_v31, %v1227_v32 }
 0x684   : > { %v1229_v34 = vadd.f32 %v1228_v33, %v1157_v22 }
 0x686   : > { %1751 = vtanh.f32 %v1229_v34  ;;  %1250 = vst.msk [vmem:[%s534_s1] sm:$0xf] %vm1241_vm13, %v1229_v34  ;;  %s2199_s1 = scalar_lea.vmem [#allocation2], %s2051_s15 }
 0x687   : > { %s1300_s22 = sshll.u32 %s2199_s1, 4  ;;  %s1301_s22 = int_to_ptr.vmem [resolvable:$true] %s1300_s22 }
 0x688   : > { %p1762_p0 = scmp.lt.s32.totalorder %s1301_s22, %s1760_s3 }
 0x690   : > { %v1752_v35 = vpop.eup %1751 }
 0x691   : > { %v1235_v36 = vmul.f32 %v1752_v35, %v1752_v35  ;;  %1245 = vst.msk [vmem:[%s518_s16] sm:$0xf] %vm1241_vm13, %v1752_v35  ;;  %s1755_s16 = scalar_lea.vmem %s1301_s22, 64 }
 0x692   : > { %p1756_p11 = scmp.ne.s32.totalorder %s1301_s22, %s1755_s16  ;;  %p1763_p1 = scmp.lt.s32.totalorder %s1761_s4, %s1755_s16 }
 0x693   : > { %v1236_v37 = vsub.f32 1.0, %v1235_v36 }
 0x694   : > { %p1757_p12 = pnand %p1756_p11, %p1931_p5  ;;  %p1764_p2 = por %p1763_p1, %p1762_p0 }
 0x695   : > { %v1237_v38 = vadd.f32 1e-06, %v1236_v37 }
 0x696   : > { %p1758_p13 = pneg %p1757_p12 }
 0x697   : > { %1753 = vlog2.f32 %v1237_v38 }
 0x698   : > { %p1765_p3 = pnand %p1764_p2, %p1758_p13 }
 0x6a1   : > { %v1754_v42 = vpop.eup %1753 }
 0x6a2   : > { %v1239_v44 = vmul.f32 0.6931472, %v1754_v42 }
 0x6a4   : > { %v1240_v45 = vsub.f32 %v1575_v43, %v1239_v44 }
 0x6a6   : > { %v1242_v46 = vsel %vm1241_vm13, %v1240_v45, 0.0 }
 0x6a7   : > { %1243 = vadd.xlane.f32.xlu0 %v1242_v46 }
 0x6a8   : > { %1768 = shalt.err (!%p1765_p3)
}
 0x6a9   : > { %s1769_s29 = scalar_lea.hbm %s2128_s24, 64  ;;  %s1773_s2 = scalar_lea.hbm %s2183_s13, 128 }
 0x6aa   : > { %p1770_p4 = scmp.ne.s32.totalorder %s2128_s24, %s1769_s29  ;;  %p1774_p9 = scmp.lt.u32.totalorder %s2128_s24, %s2183_s13 }
 0x6ab   : > { %p1775_p10 = scmp.lt.u32.totalorder %s1773_s2, %s1769_s29  ;;  %p1777_p12 = scmp.lt.u32.totalorder %s1769_s29, %s2128_s24 }
 0x6ac   : > { %p1771_p7 = pnand %p1770_p4, %p1931_p5 }
 0x6ad   : > { %p1776_p11 = por %p1775_p10, %p1774_p9 }
 0x6ae   : > { %p1772_p8 = pneg %p1771_p7 }
 0x6af   : > { %p1778_p13 = por %p1777_p12, %p1776_p11 }
 0x6b1   : > { %p1779_p0 = pnand %p1778_p13, %p1772_p8 }
 0x6b3   : > { %1782 = shalt.err (!%p1779_p0)
}
 0x6b4   : > { %1681 = dma.vmem_to_hbm [thread:$0]  (%p1931_p5), %s1301_s22, 64, %s2128_s24, %s1272_s30   ;;  %vm1248_vm14 = vcmask 3072  }
 0x6b5   : > { %s530_s23 = scalar_lea.vmem %s2181_s11, %s2022_s20 }
 0x734   : > { %v1244_v47 = vpop.xlane.xlu0 %1243 }
 0x735   : > { %1249 = vst.msk [vmem:[%s530_s23] sm:$0xf] %vm1248_vm14, %v1244_v47 }
 0x736 PF: > { %p1687_p1 = scmp.ge.s32.totalorder %s1817_s28, 2  ;;  %s1347_s17 = sand.u32 1, %s1805_s25  }
 0x737   : > { %s1348_s16 = scalar_lea.sflag [#allocation3], %s1347_s17 }
 0x738   : > { %p1684_p2 = pnand %p1687_p1, %p1935_p6 }
 0x73a   : > { %1800 = dma.done.wait (!%p1684_p2), %s1348_s16, 64  }
 0x73b   : > { %1802 = vsyncadd (!%p1684_p2), %s1348_s16, 4294967232  ;;  %s2201_s18 = sld [smem:[#allocation5_spill]]  ;;  %p24_p5 = scmp.ge.s32.totalorder %s1918_s14, 4  }
 0x73c   : > { %s2202_s25 = smov %s1809_s26  ;;  %s2203_s26 = smov %s1813_s27 }
 0x73d   : > { %s2205_s28 = smov %s1918_s14  ;;  %26 = sbr.rel (!%p24_p5) target bundleno = 9 (0x9), region = 163 }
 0x741   : > { %s2204_s27 = smov %s2201_s18 }
 0x744   :  { %1353 = vsyncpa [#allocation3], 1 }
 0x745   :  { %1355 = vsyncpa [#allocation3 + $0x1], 1 }

</bundles_post_ra>
